<compile_context>
chip_gen: v7x
topology: tpu7x:2x2x1
jax: 0.10.0
libtpu: 0.0.40
codegen_flags: <defaults>
</compile_context>

<pallas_src>
import functools

import jax
import jax.numpy as jnp
from jax.experimental import pallas as pl
from jax.experimental.pallas import tpu as pltpu

_VMEM_LIMIT = 32 * 1024 * 1024  # explicit scoped-VMEM budget (safe on v5e/v6e/v7x)


# --------------------------------------------------------------------------- phase 1
def _proj_kernel(x_ref, wih0_ref, b0_ref, wskip_ref, bskip_ref, xg_ref, xs_ref):
    """One big MXU push per time block: layer-0 input projection + skip path."""
    x = x_ref[...]                                        # (T_BLK*Bp, I) bf16
    xg_ref[...] = (jnp.dot(x, wih0_ref[...], preferred_element_type=jnp.float32)
                   + b0_ref[...])
    xs_ref[...] = jnp.maximum(
        jnp.dot(x, wskip_ref[...], preferred_element_type=jnp.float32)
        + bskip_ref[...], 0.0)


# --------------------------------------------------------------------------- phase 2
def _recur_kernel(xg_ref, xs_ref, lens_ref, whh0_ref, w1_ref, b1_ref,
                  h0_ref, c0_ref, gamma_ref, beta_ref,
                  wm1_ref, bm1_ref, wm2_ref, bm2_ref,
                  out_ref,
                  h0s, c0s, h1s, c1s, accs,
                  *, T, T_BLK, H, UNROLL):
    tb = pl.program_id(0)
    B = out_ref.shape[0]
    mm_dtype = whh0_ref.dtype

    @pl.when(tb == 0)
    def _init():
        h0s[...] = h0_ref[0]
        c0s[...] = c0_ref[0]
        h1s[...] = h0_ref[1]
        c1s[...] = c0_ref[1]
        accs[...] = jnp.zeros_like(accs)

    # Loop-invariant loads / broadcasts hoisted out of the time loop.
    whh0 = whh0_ref[...]                                  # (H, 4H)   bf16
    w1 = w1_ref[...]                                      # (2H, 4H)  bf16
    b1 = jnp.broadcast_to(b1_ref[...], (B, 4 * H))        # (B, 4H)   f32
    gamma = gamma_ref[...]                                # (1, H)
    beta = jnp.broadcast_to(beta_ref[...], (B, H))        # (B, H)
    lens = lens_ref[...]                                  # (B, 1)    int32
    t_base = tb * T_BLK

    def step(i, carry):
        h0, c0, h1, c1, acc = carry
        # ---- LSTM layer 0: x-projection precomputed; only h @ W_hh0 on the
        #      serial path.  Gate column order: [i | f | o | g].
        g0 = xg_ref[i] + jnp.dot(h0.astype(mm_dtype), whh0,
                                 preferred_element_type=jnp.float32)
        s0 = jax.nn.sigmoid(g0[:, :3 * H])
        z0 = jnp.tanh(g0[:, 3 * H:])
        c0n = s0[:, H:2 * H] * c0 + s0[:, :H] * z0
        h0n = s0[:, 2 * H:] * jnp.tanh(c0n)
        # ---- LSTM layer 1: merged input+recurrent matmul.
        g1 = jnp.dot(jnp.concatenate([h0n, h1], axis=-1).astype(mm_dtype), w1,
                     preferred_element_type=jnp.float32) + b1
        s1 = jax.nn.sigmoid(g1[:, :3 * H])
        z1 = jnp.tanh(g1[:, 3 * H:])
        c1n = s1[:, H:2 * H] * c1 + s1[:, :H] * z1
        h1n = s1[:, 2 * H:] * jnp.tanh(c1n)
        # ---- pad_packed_sequence masking, ReLU, single-pass LayerNorm.
        valid = (t_base + i) < lens                       # (B, 1)
        r = jnp.maximum(jnp.where(valid, h1n, 0.0), 0.0)
        mu = jnp.mean(r, axis=-1, keepdims=True)
        var = jnp.maximum(jnp.mean(r * r, axis=-1, keepdims=True) - mu * mu, 0.0)
        ln = (r - mu) * (gamma * jax.lax.rsqrt(var + 1e-5)) + beta
        return h0n, c0n, h1n, c1n, acc + ln

    carry = (h0s[...], c0s[...], h1s[...], c1s[...], accs[...])
    carry = jax.lax.fori_loop(0, T_BLK, step, carry, unroll=UNROLL)
    h0s[...], c0s[...], h1s[...], c1s[...] = carry[0], carry[1], carry[2], carry[3]
    # Skip path (already ReLU'd in phase 1): add this block's time-sum once.
    accs[...] = carry[4] + jnp.sum(xs_ref[...], axis=0)

    @pl.when(tb == pl.num_programs(0) - 1)
    def _finalize():
        pooled = accs[...] * (1.0 / T)                    # torch.mean over padded T
        hmid = jnp.maximum(
            jnp.dot(pooled.astype(mm_dtype), wm1_ref[...],
                    preferred_element_type=jnp.float32) + bm1_ref[...], 0.0)
        out_ref[...] = (jnp.dot(hmid.astype(mm_dtype), wm2_ref[...],
                                preferred_element_type=jnp.float32) + bm2_ref[...])


# --------------------------------------------------------------------------- wrapper
def _round_up(n, m):
    return ((n + m - 1) // m) * m


def critic_forward(x, seq_lengths, params, *, t_block=8, unroll=2):
    """x: (B, T, I) float32 batch-first; seq_lengths: (B,) int (max must equal T)."""
    B, T, I = x.shape
    H = params["gamma"].shape[-1]
    mm_dtype = params["w_ih0"].dtype
    Bp = _round_up(B, 8)                                  # pad batch to 8 sublanes

    t_block = min(t_block, T)
    while T % t_block:
        t_block -= 1
    n_blocks = T // t_block
    row_blk = t_block * Bp

    # Pad batch; padded rows have length 0 and are dropped at the end.
    xp = jnp.zeros((Bp, T, I), x.dtype).at[:B].set(x)
    lens = jnp.zeros((Bp, 1), jnp.int32).at[:B, 0].set(seq_lengths.astype(jnp.int32))
    h0 = jnp.zeros((2, Bp, H), jnp.float32).at[:, :B].set(params["h0"])
    c0 = jnp.zeros((2, Bp, H), jnp.float32).at[:, :B].set(params["c0"])

    # Time-major + bf16 cast fused in XLA; flatten to 2D (metadata-only reshape).
    x2d = jnp.transpose(xp, (1, 0, 2)).astype(mm_dtype).reshape(T * Bp, I)

    def _whole(a):
        nd = a.ndim
        return pl.BlockSpec(a.shape, lambda t, _n=nd: (0,) * _n)

    # ---- phase 1: input projections (fully parallel over time blocks) -------------
    xg2d, xs2d = pl.pallas_call(
        _proj_kernel,
        grid=(n_blocks,),
        in_specs=[
            pl.BlockSpec((row_blk, I), lambda t: (t, 0)),
            _whole(params["w_ih0"]), _whole(params["b0"]),
            _whole(params["w_skip"]), _whole(params["b_skip"]),
        ],
        out_specs=[
            pl.BlockSpec((row_blk, 4 * H), lambda t: (t, 0)),
            pl.BlockSpec((row_blk, H), lambda t: (t, 0)),
        ],
        out_shape=[
            jax.ShapeDtypeStruct((T * Bp, 4 * H), jnp.float32),
            jax.ShapeDtypeStruct((T * Bp, H), jnp.float32),
        ],
        compiler_params=pltpu.CompilerParams(
            dimension_semantics=("parallel",), vmem_limit_bytes=_VMEM_LIMIT),
    )(x2d, params["w_ih0"], params["b0"], params["w_skip"], params["b_skip"])

    xg = xg2d.reshape(T, Bp, 4 * H)                       # metadata-only
    xs = xs2d.reshape(T, Bp, H)

    # ---- phase 2: serial recurrence, streamed over time blocks --------------------
    kernel = functools.partial(_recur_kernel, T=T, T_BLK=t_block, H=H, UNROLL=unroll)
    out = pl.pallas_call(
        kernel,
        grid=(n_blocks,),
        in_specs=[
            pl.BlockSpec((t_block, Bp, 4 * H), lambda t: (t, 0, 0)),
            pl.BlockSpec((t_block, Bp, H), lambda t: (t, 0, 0)),
            _whole(lens), _whole(params["w_hh0"]), _whole(params["w1"]),
            _whole(params["b1"]), _whole(h0), _whole(c0),
            _whole(params["gamma"]), _whole(params["beta"]),
            _whole(params["w_m1"]), _whole(params["b_m1"]),
            _whole(params["w_m2"]), _whole(params["b_m2"]),
        ],
        out_specs=pl.BlockSpec((Bp, 1), lambda t: (0, 0)),
        out_shape=jax.ShapeDtypeStruct((Bp, 1), jnp.float32),
        scratch_shapes=[pltpu.VMEM((Bp, H), jnp.float32)] * 5,
        compiler_params=pltpu.CompilerParams(
            dimension_semantics=("arbitrary",), vmem_limit_bytes=_VMEM_LIMIT),
    )(xg, xs, lens, params["w_hh0"], params["w1"], params["b1"],
      h0, c0, params["gamma"], params["beta"],
      params["w_m1"], params["b_m1"], params["w_m2"], params["b_m2"])

    return out[:B]


# --------------------------------------------------------------------------- params
def _xavier_normal(key, shape_out_in):
    out_f, in_f = shape_out_in
    std = (2.0 / (in_f + out_f)) ** 0.5
    return std * jax.random.normal(key, shape_out_in, jnp.float32)


def make_params(key, input_size, hidden_size, num_layers, batch,
                mm_dtype=jnp.bfloat16):
    assert num_layers == 2, "kernel is specialized for num_layers=2"
    I, H, B, L = input_size, hidden_size, batch, num_layers
    ks = jax.random.split(key, 10)
    p = {}
    # LSTM layer 0 (weights stored (in, 4H), gate-column order [i | f | o | g];
    # a converter from a torch state_dict would permute the PyTorch [i,f,g,o] rows).
    p["w_ih0"] = _xavier_normal(ks[0], (4 * H, I)).T.astype(mm_dtype)
    p["w_hh0"] = _xavier_normal(ks[1], (4 * H, H)).T.astype(mm_dtype)
    p["b0"] = jnp.zeros((1, 4 * H), jnp.float32)          # b_ih0 + b_hh0 (zero init)
    # LSTM layer 1 stored pre-merged as [W_ih1; W_hh1] -> one matmul per step.
    w_ih1 = _xavier_normal(ks[2], (4 * H, H)).T
    w_hh1 = _xavier_normal(ks[3], (4 * H, H)).T
    p["w1"] = jnp.concatenate([w_ih1, w_hh1], axis=0).astype(mm_dtype)   # (2H, 4H)
    p["b1"] = jnp.zeros((1, 4 * H), jnp.float32)
    # Initial states (torch re-draws xavier_normal every forward; fixed draw here).
    std_hc = (2.0 / (B * H + L * H)) ** 0.5
    p["h0"] = std_hc * jax.random.normal(ks[4], (L, B, H), jnp.float32)
    p["c0"] = std_hc * jax.random.normal(ks[5], (L, B, H), jnp.float32)
    # LayerNorm
    p["gamma"] = jnp.ones((1, H), jnp.float32)
    p["beta"] = jnp.zeros((1, H), jnp.float32)
    # Skip connection Linear(I, H)
    p["w_skip"] = _xavier_normal(ks[6], (H, I)).T.astype(mm_dtype)
    p["b_skip"] = jnp.zeros((1, H), jnp.float32)
    # MLP head
    p["w_m1"] = _xavier_normal(ks[7], (H, H)).T.astype(mm_dtype)
    p["b_m1"] = jnp.zeros((1, H), jnp.float32)
    p["w_m2"] = _xavier_normal(ks[8], (1, H)).T.astype(mm_dtype)
    p["b_m2"] = jnp.zeros((1, 1), jnp.float32)
    return p


if __name__ == "__main__":
    B, T, I, H, L = 2, 16, 16, 32, 2
    key = jax.random.PRNGKey(0)
    kp, kx = jax.random.split(key)
    params = make_params(kp, I, H, L, B)
    x = jax.random.normal(kx, (B, T, I), jnp.float32)
    # max(seq_lengths) must equal T (required by the PyTorch forward for the add)
    seq_lengths = jnp.array([T, 10], jnp.int32)

    out = jax.block_until_ready(critic_forward(x, seq_lengths, params))
    assert out.shape == (B, 1) and out.dtype == jnp.float32
    print("KERNEL_OK")
</pallas_src>

<mosaic_0001>
module attributes {stable_mosaic.version = 11 : i64} {
  func.func @_proj_kernel(%arg0: i32, %arg1: memref<64x16xbf16, #tpu.memory_space<vmem>>, %arg2: memref<16x128xbf16, #tpu.memory_space<vmem>>, %arg3: memref<1x128xf32, #tpu.memory_space<vmem>>, %arg4: memref<16x32xbf16, #tpu.memory_space<vmem>>, %arg5: memref<1x32xf32, #tpu.memory_space<vmem>>, %arg6: memref<64x128xf32, #tpu.memory_space<vmem>>, %arg7: memref<64x32xf32, #tpu.memory_space<vmem>>) attributes {dimension_semantics = [#tpu.dimension_semantics<parallel>], iteration_bounds = array<i64: 2>, scalar_prefetch = 0 : i64, scratch_operands = 0 : i64, tpu.core_type = #tpu.core_type<tc>, window_params = [{transform_indices = @transform_0, window_bounds = array<i64: 64, 16>}, {pipeline_mode = #tpu.pipeline_mode<synchronous>, transform_indices = @transform_1, window_bounds = array<i64: 16, 128>}, {pipeline_mode = #tpu.pipeline_mode<synchronous>, transform_indices = @transform_2, window_bounds = array<i64: 1, 128>}, {pipeline_mode = #tpu.pipeline_mode<synchronous>, transform_indices = @transform_3, window_bounds = array<i64: 16, 32>}, {pipeline_mode = #tpu.pipeline_mode<synchronous>, transform_indices = @transform_4, window_bounds = array<i64: 1, 32>}, {transform_indices = @transform_5, window_bounds = array<i64: 64, 128>}, {transform_indices = @transform_6, window_bounds = array<i64: 64, 32>}]} {
    %c0 = arith.constant 0 : index
    %c0_0 = arith.constant 0 : index
    %0 = vector.load %arg1[%c0, %c0_0] : memref<64x16xbf16, #tpu.memory_space<vmem>>, vector<64x16xbf16>
    %c0_1 = arith.constant 0 : index
    %c0_2 = arith.constant 0 : index
    %1 = vector.load %arg2[%c0_1, %c0_2] : memref<16x128xbf16, #tpu.memory_space<vmem>>, vector<16x128xbf16>
    %cst = arith.constant dense<0.000000e+00> : vector<64x128xf32>
    %2 = tpu.matmul %0, %1, %cst {dimension_numbers = #tpu.dot_dimension_numbers<[1], [0], [0], [1], [0, 0, 1, 1], [], []>} : vector<64x16xbf16>, vector<16x128xbf16>, vector<64x128xf32> -> vector<64x128xf32>
    %c0_3 = arith.constant 0 : index
    %c0_4 = arith.constant 0 : index
    %3 = vector.load %arg3[%c0_3, %c0_4] : memref<1x128xf32, #tpu.memory_space<vmem>>, vector<1x128xf32>
    %4 = vector.broadcast %3 : vector<1x128xf32> to vector<64x128xf32>
    %5 = arith.addf %2, %4 : vector<64x128xf32>
    %c0_5 = arith.constant 0 : index
    %c0_6 = arith.constant 0 : index
    %6 = vector.load %arg6[%c0_5, %c0_6] : memref<64x128xf32, #tpu.memory_space<vmem>>, vector<64x128xf32>
    tpu.vector_store %arg6[%c0_5, %c0_6], %5 {strides = array<i32>} : memref<64x128xf32, #tpu.memory_space<vmem>>, vector<64x128xf32>,
    %c0_7 = arith.constant 0 : index
    %c0_8 = arith.constant 0 : index
    %7 = vector.load %arg4[%c0_7, %c0_8] : memref<16x32xbf16, #tpu.memory_space<vmem>>, vector<16x32xbf16>
    %cst_9 = arith.constant dense<0.000000e+00> : vector<64x32xf32>
    %8 = tpu.matmul %0, %7, %cst_9 {dimension_numbers = #tpu.dot_dimension_numbers<[1], [0], [0], [1], [0, 0, 1, 1], [], []>} : vector<64x16xbf16>, vector<16x32xbf16>, vector<64x32xf32> -> vector<64x32xf32>
    %c0_10 = arith.constant 0 : index
    %c0_11 = arith.constant 0 : index
    %9 = vector.load %arg5[%c0_10, %c0_11] : memref<1x32xf32, #tpu.memory_space<vmem>>, vector<1x32xf32>
    %10 = vector.broadcast %9 : vector<1x32xf32> to vector<64x32xf32>
    %11 = arith.addf %8, %10 : vector<64x32xf32>
    %cst_12 = arith.constant 0.000000e+00 : f32
    %12 = vector.broadcast %cst_12 : f32 to vector<64x32xf32>
    %13 = arith.maximumf %11, %12 : vector<64x32xf32>
    %c0_13 = arith.constant 0 : index
    %c0_14 = arith.constant 0 : index
    %14 = vector.load %arg7[%c0_13, %c0_14] : memref<64x32xf32, #tpu.memory_space<vmem>>, vector<64x32xf32>
    tpu.vector_store %arg7[%c0_13, %c0_14], %13 {strides = array<i32>} : memref<64x32xf32, #tpu.memory_space<vmem>>, vector<64x32xf32>,
    return
  }
  func.func @transform_0(%arg0: i32) -> (i32, i32) {
    %c0_i32 = arith.constant 0 : i32
    %c0_i32_0 = arith.constant 0 : i32
    return %arg0, %c0_i32 : i32, i32
  }
  func.func @transform_1(%arg0: i32) -> (i32, i32) {
    %c0_i32 = arith.constant 0 : i32
    %c0_i32_0 = arith.constant 0 : i32
    %c0_i32_1 = arith.constant 0 : i32
    return %c0_i32, %c0_i32_0 : i32, i32
  }
  func.func @transform_2(%arg0: i32) -> (i32, i32) {
    %c0_i32 = arith.constant 0 : i32
    %c0_i32_0 = arith.constant 0 : i32
    %c0_i32_1 = arith.constant 0 : i32
    return %c0_i32, %c0_i32_0 : i32, i32
  }
  func.func @transform_3(%arg0: i32) -> (i32, i32) {
    %c0_i32 = arith.constant 0 : i32
    %c0_i32_0 = arith.constant 0 : i32
    %c0_i32_1 = arith.constant 0 : i32
    return %c0_i32, %c0_i32_0 : i32, i32
  }
  func.func @transform_4(%arg0: i32) -> (i32, i32) {
    %c0_i32 = arith.constant 0 : i32
    %c0_i32_0 = arith.constant 0 : i32
    %c0_i32_1 = arith.constant 0 : i32
    return %c0_i32, %c0_i32_0 : i32, i32
  }
  func.func @transform_5(%arg0: i32) -> (i32, i32) {
    %c0_i32 = arith.constant 0 : i32
    %c0_i32_0 = arith.constant 0 : i32
    return %arg0, %c0_i32 : i32, i32
  }
  func.func @transform_6(%arg0: i32) -> (i32, i32) {
    %c0_i32 = arith.constant 0 : i32
    %c0_i32_0 = arith.constant 0 : i32
    return %arg0, %c0_i32 : i32, i32
  }
}

</mosaic_0001>

<bundles_post_ra>
// kernel: tpu_custom_call.1
= control target key start
LH: loop header
LB: loop body
LE: loop exit
PB: predicated region body
PF: predicated region fallthrough
CT: control target
= control target key end

     0   :  { %12 = vsyncpa [#allocation3], 0  ;;  %s968_s0 = inlined_call_operand.vmem [shape: bf16[128,16], index: 0, kind: input, shape index: {}]   ;;  %s969_s1 = inlined_call_operand.vmem [shape: bf16[16,128], index: 1, kind: input, shape index: {}]   ;;  %s970_s2 = inlined_call_operand.vmem [shape: f32[1,128], index: 2, kind: input, shape index: {}]   ;;  %s971_s3 = inlined_call_operand.vmem [shape: bf16[16,32], index: 3, kind: input, shape index: {}]   ;;  %s972_s4 = inlined_call_operand.vmem [shape: f32[1,32], index: 4, kind: input, shape index: {}]   ;;  %s973_s5 = inlined_call_operand.hbm [shape: f32[128,128], index: 5, kind: output, shape index: {0}]   ;;  %s974_s6 = inlined_call_operand.vmem [shape: f32[128,32], index: 6, kind: output, shape index: {1}]  }
   0x1   :  { %14 = vsyncpa [#allocation3 + $0x1], 0  ;;  %s814_s21 = smov 0   ;;  %s816_s22 = smov 0  }
   0x2   :  { %s818_s23 = smov 0   ;;  %s820_s24 = smov 0  }
   0x3 LB: > { %s835_s25 = sadd.s32 4294967295, %s774_s24   ;;  %s604_s26 = sadd.s32 4294967294, %s774_s24   ;;  %s774_s24 = sphi %s820_s24, %s980_s24   ;;  %s770_s23 = sphi %s818_s23, %s979_s23   ;;  %s766_s22 = sphi %s816_s22, %s978_s22   ;;  %s762_s21 = sphi %s814_s21, %s977_s21  }
   0x4   : > { %s839_s27 = sadd.s32 1, %s774_s24   ;;  %s137_s28 = sadd.s32 1, %s770_s23 }
   0x5   : > { %s134_s29 = ssub.s32 %s774_s24, %s839_s27  ;;  %p147_p0 = scmp.ne.s32.totalorder %s770_s23, %s766_s22 }
   0x6   : > { %p135_p1 = scmp.eq.s32.totalorder %s134_s29, 0  ;;  %p148_p2 = scmp.eq.s32.totalorder %s835_s25, 1 }
   0x7   : > { %p153_p3 = scmp.ne.s32.totalorder %s766_s22, %s762_s21  ;;  %p154_p4 = scmp.eq.s32.totalorder %s604_s26, 1 }
   0x8   : > { %s850_s30 = scalar_select %p135_p1, %s770_s23, %s137_s28  }
   0x9   : > { %p852_p5 = por %p148_p2, %p147_p0  ;;  %p856_p6 = por %p154_p4, %p153_p3 }
   0xa   : > { %p607_p7 = scmp.ge.s32.totalorder %s774_s24, 1  ;;  %p219_p8 = scmp.lt.s32.totalorder %s774_s24, 3 }
   0xc   : > { %p220_p9 = pnand %p607_p7, %p219_p8 }
   0xd   : > { %v706_v0 = vld [vmem:[%s969_s1] sm:$0xff] (!%p220_p9)   ;;  %s609_s11 = sshll.u32 (!%p220_p9), %s835_s25, 3  ;;  %vm311_vm0 = vcmask (!%p220_p9), 130048   ;;  %s244_s18 = sand.u32 (!%p220_p9), 1, %s766_s22   ;;  %vm485_vm1 = vcmask (!%p220_p9), 261120  }
   0xe   : > { %223 = sbr.rel (%p220_p9) target bundleno = 267 (0x10b), region = 40  ;;  %v707_v1 = vld [vmem:[%s971_s3] sm:$0xff] (!%p220_p9)   ;;  %p255_p10 = scmp.lt.s32.totalorder (!%p220_p9), %s609_s11, 15  ;;  %645 = vmatprep.subr.bf16.mxu0 (!%p220_p9), %v706_v0 }
   0xf   : > { %655 = vmatprep.subr.bf16.mxu1 (!%p220_p9), %v707_v1  ;;  %646 = vmatpush3.bf16.msra.mxu0 (!%p220_p9), %v706_v0  ;;  %s608_s19 = sshll.u32 (!%p220_p9), %s244_s18, 6  ;;  %v613_v6 = vld [vmem:[%s970_s2] ss:$0 sm:$0xff] (!%p220_p9)  ;;  %s776_s26 = smov (!%p220_p9), [#allocation2]  }
  0x10   : > { %656 = vmatpush3.bf16.msra.mxu1 (!%p220_p9), %v707_v1  ;;  %v623_v7 = vld [vmem:[%s972_s4] ss:$0 sm:$0xff] (!%p220_p9)  ;;  %s716_s28 = sshll.u32 (!%p220_p9), %s776_s26, 4  ;;  %s717_s28 = int_to_ptr.vmem [resolvable:$false] %s716_s28 }
  0x11   : > { %s718_s29 = scalar_lea.vmem (!%p220_p9), %s717_s28, 2048 }
  0x15   : > { %s982_s11 = smov (!%p255_p10, %s609_s11), 15 }
  0x16   : > { %s610_s14 = sshll.u32 %s982_s11, 2  ;;  %s612_s9 = sshll.u32 %s982_s11, 3 }
  0x17   : > { %s258_s17 = scalar_lea.vmem %s968_s0, %s610_s14  ;;  %s888_s13 = scalar_lea.vmem %s974_s6, %s612_s9 }
  0x18   : > { %v708_v2 = vld [vmem:[%s258_s17] sm:$0xff]   ;;  %v709_v3 = vld [vmem:[%s258_s17 + $0x8] sm:$0xff]   ;;  %v710_v4 = vld [vmem:[%s258_s17 + $0x10] sm:$0xff]   ;;  %s890_s14 = scalar_lea.vmem [#allocation2], %s608_s19  ;;  %s634_s11 = sshll.u32 %s835_s25, 10 }
  0x19   : > { %647 = vmatprep.mubr.msk.bf16.mxu0 %vm311_vm0, %v708_v2  ;;  %657 = vmatprep.mubr.msk.bf16.mxu1 %vm311_vm0, %v708_v2  ;;  %v711_v5 = vld [vmem:[%s258_s17 + $0x18] sm:$0xff]   ;;  %s513_s15 = sshll.u32 %s890_s14, 4  ;;  %s910_s17 = scalar_lea.hbm %s973_s5, %s634_s11  ;;  %s912_s15 = int_to_ptr.vmem [resolvable:$true] %s513_s15 }
  0x1a   : > { %648 = vmatmul.mubr.msk.bf16.vlgmr.msra.gmra.mrb[0].mxu0 %vm311_vm0, %v709_v3  ;;  %658 = vmatmul.mubr.msk.bf16.vlgmr.msra.gmra.mrb[0].mxu1 %vm311_vm0, %v709_v3  ;;  %s925_s19 = scalar_lea.sflag [#allocation3], %s244_s18  ;;  %s712_s20 = scalar_lea.vmem %s912_s15, 1024 }
  0x1b   : > { %651 = vmatprep.mubr.msk.bf16.mxu0 %vm311_vm0, %v710_v4  ;;  %661 = vmatprep.mubr.msk.bf16.mxu1 %vm311_vm0, %v710_v4  ;;  %p713_p11 = scmp.ne.s32.totalorder %s912_s15, %s712_s20  ;;  %p719_p0 = scmp.lt.s32.totalorder %s912_s15, %s717_s28 }
  0x1c   : > { %p720_p1 = scmp.lt.s32.totalorder %s718_s29, %s712_s20 }
  0x1d   : > { %p714_p12 = pnand %p713_p11, %p852_p5 }
  0x1e   : > { %p721_p2 = por %p720_p1, %p719_p0 }
  0x1f   : > { %p715_p13 = pneg %p714_p12 }
  0x21   : > { %p722_p3 = pnand %p721_p2, %p715_p13 }
  0x22   : > { %652 = vmatmul.mubr.msk.bf16.gmra.mrb[4].mxu0 %vm311_vm0, %v711_v5  ;;  %662 = vmatmul.mubr.msk.bf16.gmra.mrb[4].mxu1 %vm311_vm0, %v711_v5 }
  0xed   : > { %v649_v8 = vpop.f32.mrb[0].mxu0  ;;  %v659_v9 = vpop.f32.mrb[0].mxu1 }
  0xee   : > { %v367_v10 = vadd.f32 %v649_v8, %v613_v6  ;;  %v455_v11 = vadd.f32 %v659_v9, %v623_v7  ;;  %v358_v12 = vpop.f32.mrb[1].mxu0  ;;  %v446_v13 = vpop.f32.mrb[1].mxu1 }
  0xef   : > { %v359_v14 = vadd.f32 %v613_v6, %v358_v12  ;;  %v447_v15 = vadd.f32 %v623_v7, %v446_v13  ;;  %v650_v16 = vpop.f32.mrb[2].mxu0  ;;  %v660_v17 = vpop.f32.mrb[2].mxu1 }
  0xf0   : > { %391 = vst [vmem:[%s890_s14 + $0x10] sm:$0xff] %v367_v10  ;;  %v479_v18 = vmax.f32 %v455_v11, 0.0  ;;  %v370_v19 = vadd.f32 %v650_v16, %v613_v6  ;;  %v458_v20 = vadd.f32 %v660_v17, %v623_v7  ;;  %v361_v21 = vpop.f32.mrb[3].mxu0  ;;  %v449_v22 = vpop.f32.mrb[3].mxu1 }
  0xf1   : > { %389 = vst [vmem:[%s890_s14] sm:$0xff] %v359_v14  ;;  %v477_v23 = vmax.f32 %v447_v15, 0.0  ;;  %v362_v24 = vadd.f32 %v613_v6, %v361_v21  ;;  %v450_v25 = vadd.f32 %v623_v7, %v449_v22 }
  0xf2   : > { %488 = vst.msk [vmem:[%s888_s13 + $0x10] sm:$0xff] %vm485_vm1, %v479_v18  ;;  %392 = vst [vmem:[%s890_s14 + $0x18] sm:$0xff] %v370_v19  ;;  %v480_v26 = vmax.f32 %v458_v20, 0.0 }
  0xf3   : > { %486 = vst.msk [vmem:[%s888_s13] sm:$0xff] %vm485_vm1, %v477_v23  ;;  %390 = vst [vmem:[%s890_s14 + $0x8] sm:$0xff] %v362_v24  ;;  %v478_v27 = vmax.f32 %v450_v25, 0.0 }
  0xf4   : > { %489 = vst.msk [vmem:[%s888_s13 + $0x18] sm:$0xff] %vm485_vm1, %v480_v26 }
  0xf5   : > { %487 = vst.msk [vmem:[%s888_s13 + $0x8] sm:$0xff] %vm485_vm1, %v478_v27  ;;  %v653_v28 = vpop.f32.mrb[4].mxu0  ;;  %v663_v29 = vpop.f32.mrb[4].mxu1 }
  0xf6   : > { %v383_v30 = vadd.f32 %v653_v28, %v613_v6  ;;  %v471_v31 = vadd.f32 %v663_v29, %v623_v7  ;;  %v374_v32 = vpop.f32.mrb[5].mxu0  ;;  %v462_v33 = vpop.f32.mrb[5].mxu1 }
  0xf7   : > { %v375_v34 = vadd.f32 %v613_v6, %v374_v32  ;;  %v463_v35 = vadd.f32 %v623_v7, %v462_v33  ;;  %v654_v36 = vpop.f32.mrb[6].mxu0  ;;  %v664_v37 = vpop.f32.mrb[6].mxu1 }
  0xf8   : > { %395 = vst [vmem:[%s890_s14 + $0x30] sm:$0xff] %v383_v30  ;;  %v483_v38 = vmax.f32 %v471_v31, 0.0  ;;  %v386_v39 = vadd.f32 %v654_v36, %v613_v6  ;;  %v474_v40 = vadd.f32 %v664_v37, %v623_v7  ;;  %v377_v41 = vpop.f32.mrb[7].mxu0  ;;  %v465_v42 = vpop.f32.mrb[7].mxu1 }
  0xf9   : > { %393 = vst [vmem:[%s890_s14 + $0x20] sm:$0xff] %v375_v34  ;;  %v481_v43 = vmax.f32 %v463_v35, 0.0  ;;  %v378_v44 = vadd.f32 %v613_v6, %v377_v41  ;;  %v466_v45 = vadd.f32 %v623_v7, %v465_v42 }
  0xfa   : > { %492 = vst.msk [vmem:[%s888_s13 + $0x30] sm:$0xff] %vm485_vm1, %v483_v38  ;;  %396 = vst [vmem:[%s890_s14 + $0x38] sm:$0xff] %v386_v39  ;;  %v484_v46 = vmax.f32 %v474_v40, 0.0 }
  0xfb   : > { %490 = vst.msk [vmem:[%s888_s13 + $0x20] sm:$0xff] %vm485_vm1, %v481_v43  ;;  %394 = vst [vmem:[%s890_s14 + $0x28] sm:$0xff] %v378_v44  ;;  %v482_v47 = vmax.f32 %v466_v45, 0.0 }
  0xfc   : > { %493 = vst.msk [vmem:[%s888_s13 + $0x38] sm:$0xff] %vm485_vm1, %v484_v46 }
  0xfd   : > { %725 = shalt.err (!%p722_p3)
}
  0xfe   : > { %s726_s18 = scalar_lea.hbm %s910_s17, 1024  ;;  %s730_s12 = scalar_lea.hbm %s973_s5, 2048 }
  0xff   : > { %p727_p4 = scmp.ne.s32.totalorder %s910_s17, %s726_s18  ;;  %p731_p9 = scmp.lt.u32.totalorder %s910_s17, %s973_s5 }
 0x100   : > { %p732_p10 = scmp.lt.u32.totalorder %s730_s12, %s726_s18  ;;  %p734_p12 = scmp.lt.u32.totalorder %s726_s18, %s910_s17 }
 0x101   : > { %p728_p7 = pnand %p727_p4, %p852_p5 }
 0x102   : > { %p733_p11 = por %p732_p10, %p731_p9 }
 0x103   : > { %p729_p8 = pneg %p728_p7 }
 0x104   : > { %p735_p13 = por %p734_p12, %p733_p11 }
 0x106   : > { %p736_p0 = pnand %p735_p13, %p729_p8 }
 0x108   : > { %739 = shalt.err (!%p736_p0)
}
 0x109   : > { %s777_s25 = smov 128   ;;  %s778_s16 = smov 8   ;;  %491 = vst.msk [vmem:[%s888_s13 + $0x28] sm:$0xff] %vm485_vm1, %v482_v47 }
 0x10a   : > { %665 = dma.vmem_to_hbm [thread:$0]  (%p852_p5), %s912_s15, 1024, %s910_s17, %s925_s19, %s777_s25, %s777_s25, %s778_s16  }
 0x10b PF: > { %p671_p1 = scmp.ge.s32.totalorder %s774_s24, 2  ;;  %s532_s20 = sand.u32 1, %s762_s21  }
 0x10c   : > { %s533_s26 = scalar_lea.sflag [#allocation3], %s532_s20 }
 0x10d   : > { %p668_p2 = pnand %p671_p1, %p856_p6 }
 0x10f   : > { %757 = dma.done.wait (!%p668_p2), %s533_s26, 1024  }
 0x110   : > { %759 = vsyncadd (!%p668_p2), %s533_s26, 4294966272  ;;  %p17_p3 = scmp.ge.s32.totalorder %s839_s27, 4   ;;  %s977_s21 = smov %s766_s22 }
 0x111   : > { %s978_s22 = smov %s770_s23  ;;  %s979_s23 = smov %s850_s30 }
 0x112   : > { %s980_s24 = smov %s839_s27  ;;  %19 = sbr.rel (!%p17_p3) target bundleno = 3 (0x3), region = 87 }
 0x119   :  { %546 = vsyncpa [#allocation3], 1 }
 0x11a   :  { %548 = vsyncpa [#allocation3 + $0x1], 1 }

</bundles_post_ra>
